<compile_context>
chip_gen: v5e
topology: v5e:2x2
jax: 0.10.0
libtpu: 0.0.40
codegen_flags: <defaults>
</compile_context>

<pallas_src>
import functools

import jax
import jax.numpy as jnp
from jax.experimental import pallas as pl
from jax.experimental.pallas import tpu as pltpu

_NEG = -1e30          # finite "-inf" so masked lanes never produce NaN


def _device_kind():
    try:
        return jax.devices()[0].device_kind.lower()
    except Exception:
        return ""


_KIND = _device_kind()
# bf16 exp only where the EUP has a bf16 path (v6e / v7x); v5e & unknown -> f32.
_EXP_DTYPE = jnp.bfloat16 if ("v6" in _KIND or "v7" in _KIND) else jnp.float32
# v7x has 64 MiB VMEM per TensorCore; v5e/v6e have 128 MiB.
_VMEM_LIMIT = (32 if "v7" in _KIND else 64) * 1024 * 1024


# ------------------------------ tiling utils ------------------------------

def _round_up(x, m):
    return (x + m - 1) // m * m


def _tile(dim, pref, align):
    """Pick a tile along `dim` (multiple of `align`).  Prefers the full dim
    (no tiling) or an exact divisor of `dim` (no padding, no output slice)."""
    if dim <= pref:
        return dim, dim
    t = pref
    lo = max(align, pref // 2)
    while t >= lo:
        if dim % t == 0:
            return t, dim
        t -= align
    return pref, _round_up(dim, pref)


def _pad2(x, r, c):
    pr, pc = r - x.shape[0], c - x.shape[1]
    if pr == 0 and pc == 0:
        return x
    return jnp.pad(x, ((0, pr), (0, pc)))


def _pad_dim(x, axis, new):
    pad = new - x.shape[axis]
    if pad == 0:
        return x
    cfg = [(0, 0)] * x.ndim
    cfg[axis] = (0, pad)
    return jnp.pad(x, cfg)


# ----------------------------- linear kernels -----------------------------

def _linear_simple_kernel(a_ref, w_ref, b_ref, o_ref, *, activation):
    # single-K fast path: no accumulator scratch, dot + bias straight to out.
    out = jnp.dot(a_ref[...], w_ref[...],
                  preferred_element_type=jnp.float32) + b_ref[...]
    if activation == "relu":
        out = jnp.maximum(out, 0.0)
    o_ref[...] = out.astype(o_ref.dtype)


def _linear_kernel(a_ref, w_ref, b_ref, o_ref, acc_ref, *, activation, n_k):
    @pl.when(pl.program_id(2) == 0)
    def _():
        acc_ref[...] = jnp.zeros_like(acc_ref)

    acc_ref[...] += jnp.dot(a_ref[...], w_ref[...],
                            preferred_element_type=jnp.float32)

    @pl.when(pl.program_id(2) == n_k - 1)
    def _():
        out = acc_ref[...] + b_ref[...]
        if activation == "relu":
            out = jnp.maximum(out, 0.0)
        o_ref[...] = out.astype(o_ref.dtype)


def pallas_linear(a, w, b, activation="none", out_dtype=jnp.bfloat16,
                  tm_pref=512, tn_pref=256, tk_pref=512):
    """Tiled matmul: (M,K)@(K,N)+b, bf16 MXU inputs, f32 accumulation."""
    M, K = a.shape
    N = w.shape[1]
    tm, Mp = _tile(M, tm_pref, 8)
    tk, Kp = _tile(K, tk_pref, 128)
    tn, Np = _tile(N, tn_pref, 128)
    ap = _pad2(a.astype(jnp.bfloat16), Mp, Kp)
    wp = _pad2(w.astype(jnp.bfloat16), Kp, Np)
    bp = _pad2(b.reshape(1, N).astype(jnp.float32), 1, Np)
    nk = Kp // tk
    cparams = pltpu.CompilerParams(
        dimension_semantics=(("parallel", "parallel")
                             if nk == 1 else
                             ("parallel", "parallel", "arbitrary")),
        vmem_limit_bytes=_VMEM_LIMIT)
    if nk == 1:
        out = pl.pallas_call(
            functools.partial(_linear_simple_kernel, activation=activation),
            grid=(Mp // tm, Np // tn),
            in_specs=[pl.BlockSpec((tm, tk), lambda i, j: (i, 0)),
                      pl.BlockSpec((tk, tn), lambda i, j: (0, j)),
                      pl.BlockSpec((1, tn), lambda i, j: (0, j))],
            out_specs=pl.BlockSpec((tm, tn), lambda i, j: (i, j)),
            out_shape=jax.ShapeDtypeStruct((Mp, Np), out_dtype),
            compiler_params=cparams,
        )(ap, wp, bp)
    else:
        out = pl.pallas_call(
            functools.partial(_linear_kernel, activation=activation, n_k=nk),
            grid=(Mp // tm, Np // tn, nk),
            in_specs=[pl.BlockSpec((tm, tk), lambda i, j, k: (i, k)),
                      pl.BlockSpec((tk, tn), lambda i, j, k: (k, j)),
                      pl.BlockSpec((1, tn), lambda i, j, k: (0, j))],
            out_specs=pl.BlockSpec((tm, tn), lambda i, j, k: (i, j)),
            out_shape=jax.ShapeDtypeStruct((Mp, Np), out_dtype),
            scratch_shapes=[pltpu.VMEM((tm, tn), jnp.float32)],
            compiler_params=cparams,
        )(ap, wp, bp)
    if Mp != M or Np != N:
        out = out[:M, :N]
    return out


def _multi_linear_kernel(*refs, n_out):
    # read the input tile once, emit several projections of it.
    x = refs[0][...]
    w_refs = refs[1:1 + n_out]
    b_refs = refs[1 + n_out:1 + 2 * n_out]
    o_refs = refs[1 + 2 * n_out:]
    for w_r, b_r, o_r in zip(w_refs, b_refs, o_refs):
        y = jnp.dot(x, w_r[...], preferred_element_type=jnp.float32) + b_r[...]
        o_r[...] = y.astype(o_r.dtype)


def pallas_multi_linear(a, ws, bs_, out_dtype=jnp.bfloat16, tm_pref=512):
    """Shared-input projections (Q/K/V, K/V): one pass over `a`, one output
    per (w, b) pair — avoids the concat-then-slice HBM round trips."""
    M, K = a.shape
    n_out = len(ws)
    tm, Mp = _tile(M, tm_pref, 8)
    ap = _pad_dim(a.astype(jnp.bfloat16), 0, Mp)
    wps = [w.astype(jnp.bfloat16) for w in ws]
    bps = [b.reshape(1, -1).astype(jnp.float32) for b in bs_]
    in_specs = [pl.BlockSpec((tm, K), lambda i: (i, 0))]
    in_specs += [pl.BlockSpec((K, w.shape[1]), lambda i: (0, 0)) for w in wps]
    in_specs += [pl.BlockSpec((1, b.shape[1]), lambda i: (0, 0)) for b in bps]
    out_specs = tuple(pl.BlockSpec((tm, w.shape[1]), lambda i: (i, 0))
                      for w in wps)
    out_shape = tuple(jax.ShapeDtypeStruct((Mp, w.shape[1]), out_dtype)
                      for w in wps)
    outs = pl.pallas_call(
        functools.partial(_multi_linear_kernel, n_out=n_out),
        grid=(Mp // tm,),
        in_specs=in_specs,
        out_specs=out_specs,
        out_shape=out_shape,
        compiler_params=pltpu.CompilerParams(
            dimension_semantics=("parallel",),
            vmem_limit_bytes=_VMEM_LIMIT),
    )(ap, *wps, *bps)
    if Mp != M:
        outs = tuple(o[:M] for o in outs)
    return tuple(outs)


def _linear_ln_kernel(a_ref, w_ref, b_ref, g_ref, bt_ref, o_ref, *, eps):
    y = jnp.dot(a_ref[...], w_ref[...],
                preferred_element_type=jnp.float32) + b_ref[...]
    mu = jnp.mean(y, axis=-1, keepdims=True)
    var = jnp.mean((y - mu) ** 2, axis=-1, keepdims=True)
    y = (y - mu) * jax.lax.rsqrt(var + eps) * g_ref[...] + bt_ref[...]
    o_ref[...] = y.astype(o_ref.dtype)


def pallas_linear_ln(a, w, b, gamma, beta, eps=1e-5,
                     out_dtype=jnp.bfloat16, tm_pref=512):
    """Fused (M,K)@(K,N)+b -> LayerNorm(N) (merge layer epilogue)."""
    M, K = a.shape
    N = w.shape[1]
    tm, Mp = _tile(M, tm_pref, 8)
    ap = _pad_dim(a.astype(jnp.bfloat16), 0, Mp)
    out = pl.pallas_call(
        functools.partial(_linear_ln_kernel, eps=eps),
        grid=(Mp // tm,),
        in_specs=[pl.BlockSpec((tm, K), lambda i: (i, 0)),
                  pl.BlockSpec((K, N), lambda i: (0, 0)),
                  pl.BlockSpec((1, N), lambda i: (0, 0)),
                  pl.BlockSpec((1, N), lambda i: (0, 0)),
                  pl.BlockSpec((1, N), lambda i: (0, 0))],
        out_specs=pl.BlockSpec((tm, N), lambda i: (i, 0)),
        out_shape=jax.ShapeDtypeStruct((Mp, N), out_dtype),
        compiler_params=pltpu.CompilerParams(
            dimension_semantics=("parallel",),
            vmem_limit_bytes=_VMEM_LIMIT),
    )(ap, w.astype(jnp.bfloat16),
      b.reshape(1, N).astype(jnp.float32),
      gamma.reshape(1, N).astype(jnp.float32),
      beta.reshape(1, N).astype(jnp.float32))
    return out[:M] if Mp != M else out


def _ffn_kernel(x_ref, m_ref, w1x_ref, w1m_ref, b1_ref, w2_ref, b2_ref,
                g_ref, bt_ref, o_ref, *, eps):
    # fused FFN: relu(x@w1x + msg@w1m + b1) @ w2 + b2 -> LN -> + x residual.
    # No concat / intermediate HBM round trips.
    x = x_ref[...]
    h = (jnp.dot(x, w1x_ref[...], preferred_element_type=jnp.float32)
         + jnp.dot(m_ref[...], w1m_ref[...], preferred_element_type=jnp.float32)
         + b1_ref[...])
    h = jnp.maximum(h, 0.0)
    y = jnp.dot(h.astype(jnp.bfloat16), w2_ref[...],
                preferred_element_type=jnp.float32) + b2_ref[...]
    mu = jnp.mean(y, axis=-1, keepdims=True)
    var = jnp.mean((y - mu) ** 2, axis=-1, keepdims=True)
    y = (y - mu) * jax.lax.rsqrt(var + eps) * g_ref[...] + bt_ref[...]
    y = y + x.astype(jnp.float32)
    o_ref[...] = y.astype(o_ref.dtype)


def pallas_ffn(x, msg, w1, b1, w2, b2, gamma, beta, eps=1e-5,
               out_dtype=jnp.bfloat16, tm_pref=1024):
    M, C = x.shape
    H = w1.shape[1]
    tm, Mp = _tile(M, tm_pref, 8)
    xp = _pad_dim(x.astype(jnp.bfloat16), 0, Mp)
    mp = _pad_dim(msg.astype(jnp.bfloat16), 0, Mp)
    out = pl.pallas_call(
        functools.partial(_ffn_kernel, eps=eps),
        grid=(Mp // tm,),
        in_specs=[pl.BlockSpec((tm, C), lambda i: (i, 0)),
                  pl.BlockSpec((tm, C), lambda i: (i, 0)),
                  pl.BlockSpec((C, H), lambda i: (0, 0)),
                  pl.BlockSpec((C, H), lambda i: (0, 0)),
                  pl.BlockSpec((1, H), lambda i: (0, 0)),
                  pl.BlockSpec((H, C), lambda i: (0, 0)),
                  pl.BlockSpec((1, C), lambda i: (0, 0)),
                  pl.BlockSpec((1, C), lambda i: (0, 0)),
                  pl.BlockSpec((1, C), lambda i: (0, 0))],
        out_specs=pl.BlockSpec((tm, C), lambda i: (i, 0)),
        out_shape=jax.ShapeDtypeStruct((Mp, C), out_dtype),
        compiler_params=pltpu.CompilerParams(
            dimension_semantics=("parallel",),
            vmem_limit_bytes=_VMEM_LIMIT),
    )(xp, mp,
      w1[:C].astype(jnp.bfloat16), w1[C:].astype(jnp.bfloat16),
      b1.reshape(1, H).astype(jnp.float32),
      w2.astype(jnp.bfloat16),
      b2.reshape(1, C).astype(jnp.float32),
      gamma.reshape(1, C).astype(jnp.float32),
      beta.reshape(1, C).astype(jnp.float32))
    return out[:M] if Mp != M else out


# ---------------------------- attention kernels ----------------------------

def _attn_full_kernel(q_ref, k_ref, v_ref, o_ref, *, exp_dtype):
    # KV-resident path: full softmax over the whole (unpadded) S per q tile.
    q = q_ref[0]
    k = k_ref[0]
    v = v_ref[0]
    s = jax.lax.dot_general(q, k, (((1,), (1,)), ((), ())),
                            preferred_element_type=jnp.float32)
    m = jnp.max(s, axis=-1, keepdims=True)
    p = jnp.exp((s - m).astype(exp_dtype))
    l = jnp.sum(p.astype(jnp.float32), axis=-1, keepdims=True)
    acc = jnp.dot(p.astype(v.dtype), v, preferred_element_type=jnp.float32)
    o_ref[0] = (acc * pl.reciprocal(l, approx=True)).astype(o_ref.dtype)


def _flash_attn_kernel(q_ref, k_ref, v_ref, o_ref, m_sc, l_sc, acc_sc, *,
                       n_kv, kv_tile, s_len, mask_cols, exp_dtype):
    kv = pl.program_id(2)

    @pl.when(kv == 0)
    def _():
        m_sc[...] = jnp.full_like(m_sc, _NEG)
        l_sc[...] = jnp.zeros_like(l_sc)
        acc_sc[...] = jnp.zeros_like(acc_sc)

    q = q_ref[0]
    k = k_ref[0]
    v = v_ref[0]
    s = jax.lax.dot_general(q, k, (((1,), (1,)), ((), ())),
                            preferred_element_type=jnp.float32)
    if mask_cols:
        col = jax.lax.broadcasted_iota(jnp.int32, s.shape, 1) + kv * kv_tile
        s = jnp.where(col < s_len, s, _NEG)
    m_prev = m_sc[...]
    m_new = jnp.maximum(m_prev, jnp.max(s, axis=-1, keepdims=True))
    alpha = jnp.exp(m_prev - m_new)
    p = jnp.exp((s - m_new).astype(exp_dtype))
    l_sc[...] = alpha * l_sc[...] + jnp.sum(p.astype(jnp.float32),
                                            axis=-1, keepdims=True)
    acc_sc[...] = alpha * acc_sc[...] + jnp.dot(
        p.astype(v.dtype), v, preferred_element_type=jnp.float32)
    m_sc[...] = m_new

    @pl.when(kv == n_kv - 1)
    def _():
        o_ref[0] = (acc_sc[...] * pl.reciprocal(l_sc[...], approx=True)
                    ).astype(o_ref.dtype)


def pallas_attention(q, k, v, out_dtype=jnp.bfloat16,
                     kv_resident_bytes=10 << 20):
    """Softmax attention (single head).  The 1/sqrt(C) scale is already folded
    into the q projection by the caller."""
    B, L, C = q.shape
    S = k.shape[1]
    kv_bytes = 2 * S * C * 2                    # K + V in bf16
    if kv_bytes <= kv_resident_bytes:
        # KV-resident: K/V are fetched from HBM once per batch element.
        tq, Lp = _tile(L, 256, 8)
        qp = _pad_dim(q.astype(jnp.bfloat16), 1, Lp)
        out = pl.pallas_call(
            functools.partial(_attn_full_kernel, exp_dtype=_EXP_DTYPE),
            grid=(B, Lp // tq),
            in_specs=[pl.BlockSpec((1, tq, C), lambda b, i: (b, i, 0)),
                      pl.BlockSpec((1, S, C), lambda b, i: (b, 0, 0)),
                      pl.BlockSpec((1, S, C), lambda b, i: (b, 0, 0))],
            out_specs=pl.BlockSpec((1, tq, C), lambda b, i: (b, i, 0)),
            out_shape=jax.ShapeDtypeStruct((B, Lp, C), out_dtype),
            compiler_params=pltpu.CompilerParams(
                dimension_semantics=("parallel", "parallel"),
                vmem_limit_bytes=_VMEM_LIMIT),
        )(qp, k.astype(jnp.bfloat16), v.astype(jnp.bfloat16))
        return out[:, :L, :]

    # fallback: flash-style tiled online softmax for very long KV.
    tq, Lp = _tile(L, 512, 8)
    tkv, Sp = _tile(S, 1024, 8)
    qp = _pad_dim(q.astype(jnp.bfloat16), 1, Lp)
    kp = _pad_dim(k.astype(jnp.bfloat16), 1, Sp)
    vp = _pad_dim(v.astype(jnp.bfloat16), 1, Sp)
    n_kv = Sp // tkv
    out = pl.pallas_call(
        functools.partial(_flash_attn_kernel, n_kv=n_kv, kv_tile=tkv,
                          s_len=S, mask_cols=Sp != S, exp_dtype=_EXP_DTYPE),
        grid=(B, Lp // tq, n_kv),
        in_specs=[pl.BlockSpec((1, tq, C), lambda b, i, j: (b, i, 0)),
                  pl.BlockSpec((1, tkv, C), lambda b, i, j: (b, j, 0)),
                  pl.BlockSpec((1, tkv, C), lambda b, i, j: (b, j, 0))],
        out_specs=pl.BlockSpec((1, tq, C), lambda b, i, j: (b, i, 0)),
        out_shape=jax.ShapeDtypeStruct((B, Lp, C), out_dtype),
        scratch_shapes=[pltpu.VMEM((tq, 1), jnp.float32),
                        pltpu.VMEM((tq, 1), jnp.float32),
                        pltpu.VMEM((tq, C), jnp.float32)],
        compiler_params=pltpu.CompilerParams(
            dimension_semantics=("parallel", "parallel", "arbitrary"),
            vmem_limit_bytes=_VMEM_LIMIT),
    )(qp, kp, vp)
    return out[:, :L, :]


# ------------------------ dual-softmax matching kernels --------------------

def _ds_stats_kernel(f0_ref, f1_ref, cmax_ref, csum_ref, *,
                     inv_temp, l_tile, l_len, mask_rows, exp_dtype):
    li = pl.program_id(1)

    @pl.when(li == 0)
    def _():
        cmax_ref[...] = jnp.full_like(cmax_ref, _NEG)
        csum_ref[...] = jnp.zeros_like(csum_ref)

    sim = jax.lax.dot_general(f0_ref[0], f1_ref[0], (((1,), (1,)), ((), ())),
                              preferred_element_type=jnp.float32) * inv_temp
    if mask_rows:
        row = jax.lax.broadcasted_iota(jnp.int32, sim.shape, 0) + li * l_tile
        sim = jnp.where(row < l_len, sim, _NEG)
    m_old = cmax_ref[0]                              # (1, S)
    m_new = jnp.maximum(m_old, jnp.max(sim, axis=0, keepdims=True))
    alpha = jnp.exp(m_old - m_new)
    e = jnp.exp((sim - m_new).astype(exp_dtype)).astype(jnp.float32)
    csum_ref[0] = csum_ref[0] * alpha + jnp.sum(e, axis=0, keepdims=True)
    cmax_ref[0] = m_new


def _ds_conf_kernel(f0_ref, f1_ref, cmax_ref, csum_ref,
                    conf_ref, mconf_ref, jids_ref, colmax_ref, *,
                    inv_temp, l_tile, l_len, mask_rows, exp_dtype):
    li = pl.program_id(1)
    sim = jax.lax.dot_general(f0_ref[0], f1_ref[0], (((1,), (1,)), ((), ())),
                              preferred_element_type=jnp.float32) * inv_temp
    if mask_rows:
        row = jax.lax.broadcasted_iota(jnp.int32, sim.shape, 0) + li * l_tile
        sim = jnp.where(row < l_len, sim, _NEG)
    rmax = jnp.max(sim, axis=-1, keepdims=True)
    rsum = jnp.sum(jnp.exp((sim - rmax).astype(exp_dtype)).astype(jnp.float32),
                   axis=-1, keepdims=True)
    cmax = cmax_ref[0]                               # (1, S)
    csum = jnp.maximum(csum_ref[0], 1e-30)           # clamp: no 0*inf NaNs
    # softmax(dim=L) * softmax(dim=S), one exp per element, small reciprocals.
    inv_r = pl.reciprocal(rsum, approx=True)
    inv_c = pl.reciprocal(csum, approx=True)
    conf = (jnp.exp((sim * 2.0 - rmax - cmax).astype(exp_dtype))
            .astype(jnp.float32) * (inv_r * inv_c))
    conf_ref[0] = conf.astype(conf_ref.dtype)

    # fused matching reductions (row max / argmax, running column max).
    cmx = jnp.max(conf, axis=-1, keepdims=True)      # (tq, 1)
    mconf_ref[0] = cmx
    col_idx = jax.lax.broadcasted_iota(jnp.float32, conf.shape, 1)
    jbest = -jnp.max(jnp.where(conf >= cmx, -col_idx, _NEG),
                     axis=-1, keepdims=True)
    jids_ref[0] = jbest.astype(jnp.int32)

    @pl.when(li == 0)
    def _():
        colmax_ref[...] = jnp.zeros_like(colmax_ref)

    colmax_ref[0] = jnp.maximum(colmax_ref[0],
                                jnp.max(conf, axis=0, keepdims=True))


def pallas_dual_softmax_match(f0, f1, inv_temp):
    """Two-pass dual-softmax: pass 1 accumulates column max/logsum online over
    L tiles; pass 2 emits a bf16 (L, S) conf matrix plus fused row-max /
    row-argmax / column-max stats so XLA never rescans the conf matrix.
    TODO(synk): add a parallel S-chunk axis in pass 1 for v7x 2-TC occupancy
    when batch == 1."""
    B, L, C = f0.shape
    S = f1.shape[1]
    tq, Lp = _tile(L, 256, 8)
    f0b = _pad_dim(f0.astype(jnp.bfloat16), 1, Lp)
    f1b = f1.astype(jnp.bfloat16)
    n_l = Lp // tq
    common = dict(inv_temp=inv_temp, l_tile=tq, l_len=L,
                  mask_rows=Lp != L, exp_dtype=_EXP_DTYPE)

    cmax, csum = pl.pallas_call(
        functools.partial(_ds_stats_kernel, **common),
        grid=(B, n_l),
        in_specs=[pl.BlockSpec((1, tq, C), lambda b, l: (b, l, 0)),
                  pl.BlockSpec((1, S, C), lambda b, l: (b, 0, 0))],
        out_specs=(pl.BlockSpec((1, 1, S), lambda b, l: (b, 0, 0)),
                   pl.BlockSpec((1, 1, S), lambda b, l: (b, 0, 0))),
        out_shape=(jax.ShapeDtypeStruct((B, 1, S), jnp.float32),
                   jax.ShapeDtypeStruct((B, 1, S), jnp.float32)),
        compiler_params=pltpu.CompilerParams(
            dimension_semantics=("parallel", "arbitrary"),
            vmem_limit_bytes=_VMEM_LIMIT),
    )(f0b, f1b)

    conf, mconf, jids, colmax = pl.pallas_call(
        functools.partial(_ds_conf_kernel, **common),
        grid=(B, n_l),
        in_specs=[pl.BlockSpec((1, tq, C), lambda b, l: (b, l, 0)),
                  pl.BlockSpec((1, S, C), lambda b, l: (b, 0, 0)),
                  pl.BlockSpec((1, 1, S), lambda b, l: (b, 0, 0)),
                  pl.BlockSpec((1, 1, S), lambda b, l: (b, 0, 0))],
        out_specs=(pl.BlockSpec((1, tq, S), lambda b, l: (b, l, 0)),
                   pl.BlockSpec((1, tq, 1), lambda b, l: (b, l, 0)),
                   pl.BlockSpec((1, tq, 1), lambda b, l: (b, l, 0)),
                   pl.BlockSpec((1, 1, S), lambda b, l: (b, 0, 0))),
        out_shape=(jax.ShapeDtypeStruct((B, Lp, S), jnp.bfloat16),
                   jax.ShapeDtypeStruct((B, Lp, 1), jnp.float32),
                   jax.ShapeDtypeStruct((B, Lp, 1), jnp.int32),
                   jax.ShapeDtypeStruct((B, 1, S), jnp.float32)),
        compiler_params=pltpu.CompilerParams(
            dimension_semantics=("parallel", "arbitrary"),
            vmem_limit_bytes=_VMEM_LIMIT),
    )(f0b, f1b, cmax, csum)

    if Lp != L:
        conf, mconf, jids = conf[:, :L], mconf[:, :L], jids[:, :L]
    return conf, mconf[..., 0], jids[..., 0], colmax[:, 0, :]


# ----------------------------- fine matching -------------------------------

def _fine_match_kernel(f0_ref, f1_ref, g_ref, o_ref, *, center, inv_temp):
    f0 = f0_ref[...]                                 # (tm, WW, C)
    f1 = f1_ref[...]
    f0c = f0[:, center:center + 1, :].astype(jnp.float32)
    # channel contraction on the VPU + lane reduce (degenerate GEMV avoided).
    sim = jnp.sum(f1.astype(jnp.float32) * f0c, axis=-1) * inv_temp  # (tm, WW)
    sim = sim - jnp.max(sim, axis=-1, keepdims=True)
    e = jnp.exp(sim)
    p = e * pl.reciprocal(jnp.sum(e, axis=-1, keepdims=True), approx=True)
    # Lane-dense (tm, 128) output: cols 0/1 = E[x]/E[y], col 2 = E[x^2+y^2].
    o_ref[...] = jnp.dot(p, g_ref[...], preferred_element_type=jnp.float32)


def pallas_fine_match(f0, f1, g128):
    M, WW, C = f0.shape
    tm, Mp = _tile(max(M, 1), 256, 8)
    f0p = _pad_dim(f0.astype(jnp.bfloat16), 0, Mp)
    f1p = _pad_dim(f1.astype(jnp.bfloat16), 0, Mp)
    out = pl.pallas_call(
        functools.partial(_fine_match_kernel, center=WW // 2,
                          inv_temp=1.0 / (C ** 0.5)),
        grid=(Mp // tm,),
        in_specs=[pl.BlockSpec((tm, WW, C), lambda i: (i, 0, 0)),
                  pl.BlockSpec((tm, WW, C), lambda i: (i, 0, 0)),
                  pl.BlockSpec((WW, 128), lambda i: (0, 0))],
        out_specs=pl.BlockSpec((tm, 128), lambda i: (i, 0)),
        out_shape=jax.ShapeDtypeStruct((Mp, 128), jnp.float32),
        compiler_params=pltpu.CompilerParams(
            dimension_semantics=("parallel",),
            vmem_limit_bytes=_VMEM_LIMIT),
    )(f0p, f1p, g128)
    return out[:M] if Mp != M else out


# ----------------------------- module pieces ------------------------------

def _conv_xla(x, w, b, stride):
    # low-Cin 3x3/s2 conv: XLA conv (no HBM im2col blow-up, no <128 MXU K).
    w_hwio = jnp.transpose(w, (2, 3, 1, 0)).astype(x.dtype)
    out = jax.lax.conv_general_dilated(
        x, w_hwio, (stride, stride), ((1, 1), (1, 1)),
        dimension_numbers=("NHWC", "HWIO", "NHWC"),
        preferred_element_type=jnp.float32)
    return jnp.maximum(out + b, 0.0).astype(jnp.bfloat16)


def conv2d_nhwc(x, w, b, stride):
    """3x3 conv (NHWC in/out), symmetric padding=1 like PyTorch Conv2d."""
    Cout, Cin, kh, kw = w.shape
    K = Cin * kh * kw
    if K < 128:
        return _conv_xla(x, w, b, stride)
    patches = jax.lax.conv_general_dilated_patches(
        x, filter_shape=(kh, kw), window_strides=(stride, stride),
        padding=((1, 1), (1, 1)),
        dimension_numbers=("NHWC", "HWIO", "NHWC"))   # (N, Ho, Wo, Cin*kh*kw)
    N2, Ho, Wo, _ = patches.shape
    a = patches.reshape(N2 * Ho * Wo, K)
    out = pallas_linear(a, w.reshape(Cout, K).T, b, activation="relu",
                        out_dtype=jnp.bfloat16)
    return out.reshape(N2, Ho, Wo, Cout)


def backbone(params, x_nchw):
    x = x_nchw.transpose(0, 2, 3, 1)                  # NCHW -> NHWC once
    x1 = conv2d_nhwc(x, params["conv1_w"], params["conv1_b"], 2)    # 1/2
    x2 = conv2d_nhwc(x1, params["conv2_w"], params["conv2_b"], 2)   # 1/4
    xc = conv2d_nhwc(x2, params["conv3_w"], params["conv3_b"], 2)   # 1/8
    return {"feats_c": xc, "feats_x2": x2, "feats_x1": x1}          # NHWC bf16


def encoder_layer(lp, x, source, is_self):
    """Single-head LoFTR encoder layer with fused projections/epilogues.
    TODO(synk): multi-head / linear(ELU) attention of the original is omitted."""
    B, L, C = x.shape
    S = source.shape[1]
    qscale = 1.0 / (C ** 0.5)                    # folded into the q projection
    x2 = x.reshape(B * L, C)
    if is_self:
        q, k, v = pallas_multi_linear(
            x2, [lp["wq"] * qscale, lp["wk"], lp["wv"]],
            [lp["bq"] * qscale, lp["bk"], lp["bv"]])
        q = q.reshape(B, L, C)
        k = k.reshape(B, S, C)
        v = v.reshape(B, S, C)
    else:
        s2 = source.reshape(B * S, C)
        q = pallas_multi_linear(x2, [lp["wq"] * qscale],
                                [lp["bq"] * qscale])[0].reshape(B, L, C)
        k, v = pallas_multi_linear(s2, [lp["wk"], lp["wv"]],
                                   [lp["bk"], lp["bv"]])
        k = k.reshape(B, S, C)
        v = v.reshape(B, S, C)

    msg = pallas_attention(q, k, v)                              # (B, L, C)
    # merge linear + LayerNorm fused; output kept bf16 for the next kernel.
    msg = pallas_linear_ln(msg.reshape(B * L, C), lp["wm"], lp["bm"],
                           lp["ln1_g"], lp["ln1_b"])
    # fused FFN (concat folded into two K-blocks) + LN + residual, in VMEM.
    y = pallas_ffn(x2, msg, lp["w1"], lp["b1"], lp["w2"], lp["b2"],
                   lp["ln2_g"], lp["ln2_b"])
    return y.reshape(B, L, C)


def loftr_coarse(params, f0, f1):
    """LocalFeatureTransformer on (B, L, C) tokens."""
    for lp, name in zip(params["coarse_layers"], params["layer_names"]):
        if name == "self":
            f0 = encoder_layer(lp, f0, f0, is_self=True)
            f1 = encoder_layer(lp, f1, f1, is_self=True)
        else:
            f0n = encoder_layer(lp, f0, f1, is_self=False)
            f1n = encoder_layer(lp, f1, f0, is_self=False)
            f0, f1 = f0n, f1n
    return f0, f1


def coarse_matching(f0, f1, hw_c, hw_i, thr, temperature):
    B, L, C = f0.shape
    # feat / sqrt(C) on each side + 1/temperature, folded into one scale.
    inv_temp = 1.0 / (C * temperature)
    conf, mconf, j_ids, colmax = pallas_dual_softmax_match(f0, f1, inv_temp)
    # mutual-NN + threshold on tiny per-row / per-col stats (no conf rescans).
    col_at_j = jnp.take_along_axis(colmax, j_ids, axis=1)
    valid = jnp.logical_and(mconf > thr, mconf >= col_at_j)
    Hc, Wc = hw_c
    scale = hw_i[0] // Hc
    i_ids = jnp.tile(jnp.arange(L)[None, :], (B, 1))
    mkpts0_c = jnp.stack([i_ids % Wc, i_ids // Wc], -1).astype(jnp.float32) * scale
    mkpts1_c = jnp.stack([j_ids % Wc, j_ids // Wc], -1).astype(jnp.float32) * scale
    # TODO(synk): PyTorch selects a variable number of matches (dynamic shape);
    # here we keep one candidate per coarse query + a validity mask.
    return {"conf_matrix": conf, "i_ids": i_ids, "j_ids": j_ids,
            "mconf": mconf, "valid": valid,
            "mkpts0_c": mkpts0_c, "mkpts1_c": mkpts1_c}


def _gather_windows(fmap, rows, cols, W):
    # TODO(synk): could be a PrefetchScalarGridSpec-driven DMA gather kernel;
    # kept as XLA vmap(dynamic_slice) glue for now.
    pad = W // 2
    fpad = jnp.pad(fmap, ((pad, pad), (pad, pad), (0, 0)))

    def one(r, c):
        return jax.lax.dynamic_slice(fpad, (r, c, 0), (W, W, fmap.shape[-1]))

    return jax.vmap(one)(rows, cols)                  # (L, W, W, Cf)


def fine_preprocess(params, f0_c, f1_c, feats_x1, match, bs, hw_c, mul, W):
    # 1x1 projection of the stride-2 backbone features (Pallas matmul).
    N2, Hf, Wf, C1 = feats_x1.shape
    a = feats_x1.reshape(N2 * Hf * Wf, C1)
    Cf = params["fine_proj_w"].shape[1]
    fine = pallas_linear(a, params["fine_proj_w"],
                         params["fine_proj_b"]).reshape(N2, Hf, Wf, Cf)
    fine0, fine1 = fine[:bs], fine[bs:]
    # TODO(synk): feats_x2 fusion of the original FinePreprocess is omitted.

    Hc, Wc = hw_c
    i_ids, j_ids = match["i_ids"], match["j_ids"]
    r0 = (i_ids // Wc) * mul + mul // 2
    c0 = (i_ids % Wc) * mul + mul // 2
    r1 = (j_ids // Wc) * mul + mul // 2
    c1 = (j_ids % Wc) * mul + mul // 2
    gw = lambda fm, r, c: _gather_windows(fm, r, c, W)
    win0 = jax.vmap(gw)(fine0, r0, c0)
    win1 = jax.vmap(gw)(fine1, r1, c1)
    L = i_ids.shape[1]
    win0 = win0.reshape(bs * L, W * W, Cf)
    win1 = win1.reshape(bs * L, W * W, Cf)

    # fuse coarse context (simplified coarse->fine fusion); the feat/sqrt(C)
    # scale of the original is folded into the fuse weight.
    Cc = f0_c.shape[-1]
    cscale = 1.0 / (Cc ** 0.5)
    fuse_w = params["coarse_fuse_w"] * cscale
    tok0 = f0_c.reshape(bs * L, Cc)
    tok1 = jnp.take_along_axis(f1_c, j_ids[..., None], axis=1).reshape(bs * L, Cc)
    fuse0 = pallas_linear(tok0, fuse_w, params["coarse_fuse_b"])
    fuse1 = pallas_linear(tok1, fuse_w, params["coarse_fuse_b"])
    return win0 + fuse0[:, None, :], win1 + fuse1[:, None, :]


def fine_matching(ff0, ff1, match, W, scale_f):
    M, WW, Cf = ff0.shape
    xs = jnp.linspace(-1.0, 1.0, W)
    gy, gx = jnp.meshgrid(xs, xs, indexing="ij")
    gxf, gyf = gx.ravel(), gy.ravel()
    # Packed projection matrix so the kernel output is a lane-dense (M, 128)
    # slab: col0=E[x], col1=E[y], col2=E[x^2+y^2] (for the spread/std).
    g128 = jnp.zeros((WW, 128), jnp.float32)
    g128 = g128.at[:, 0].set(gxf).at[:, 1].set(gyf)
    g128 = g128.at[:, 2].set(gxf * gxf + gyf * gyf)
    mm = pallas_fine_match(ff0, ff1, g128)                       # (M, 128)
    coords = mm[:, :2]
    sum_var = mm[:, 2] - coords[:, 0] ** 2 - coords[:, 1] ** 2
    std = jnp.sqrt(jnp.clip(sum_var, 1e-10, None))[:, None]
    expec_f = jnp.concatenate([coords, std], axis=-1)            # (M, 3)
    mkpts0_f = match["mkpts0_c"].reshape(M, 2)
    mkpts1_f = match["mkpts1_c"].reshape(M, 2) + coords * (W // 2) * scale_f
    return expec_f, mkpts0_f, mkpts1_f


# ----------------------------- full forward -------------------------------

def loftr_forward(params, data, config):
    image0, image1 = data["image0"], data["image1"]              # (N,1,H,W)
    bs = image0.shape[0]
    hw_i = image0.shape[2:]
    # shared backbone on the concatenated pair (hw0_i == hw1_i inference path)
    ret = backbone(params, jnp.concatenate([image0, image1], axis=0))
    feats_c = ret["feats_c"]                                     # NHWC
    feat_c0, feat_c1 = feats_c[:bs], feats_c[bs:]
    hw_c = feat_c0.shape[1:3]
    mul = config["resolution"][0] // config["resolution"][1]
    hw_f = (hw_c[0] * mul, hw_c[1] * mul)
    C = feat_c0.shape[-1]
    f0 = feat_c0.reshape(bs, hw_c[0] * hw_c[1], C)               # n (h w) c
    f1 = feat_c1.reshape(bs, hw_c[0] * hw_c[1], C)

    f0, f1 = loftr_coarse(params, f0, f1)

    match = coarse_matching(f0, f1, hw_c, hw_i,
                            thr=config["match_thr"],
                            temperature=config["dsmax_temperature"])

    W = config["fine_window"]
    ff0, ff1 = fine_preprocess(params, f0, f1, ret["feats_x1"],
                               match, bs, hw_c, mul, W)
    scale_f = hw_i[0] // hw_f[0]
    expec_f, mkpts0_f, mkpts1_f = fine_matching(ff0, ff1, match, W, scale_f)

    out = dict(match)
    out.update({"expec_f": expec_f, "mkpts0_f": mkpts0_f, "mkpts1_f": mkpts1_f})
    return out


# ----------------------------- parameters ---------------------------------

def init_params(key, config):
    Cc, Cf = config["coarse_dim"], config["fine_dim"]
    c1, c2 = 8, 16
    keys = iter(jax.random.split(key, 64))

    def nrm(shape, scale=0.1):
        return jax.random.normal(next(keys), shape, jnp.float32) * scale

    def zeros(shape):
        return jnp.zeros(shape, jnp.float32)

    params = {
        "conv1_w": nrm((c1, 1, 3, 3)),  "conv1_b": zeros((c1,)),
        "conv2_w": nrm((c2, c1, 3, 3)), "conv2_b": zeros((c2,)),
        "conv3_w": nrm((Cc, c2, 3, 3)), "conv3_b": zeros((Cc,)),
        "fine_proj_w": nrm((c1, Cf)),   "fine_proj_b": zeros((Cf,)),
        "coarse_fuse_w": nrm((Cc, Cf)), "coarse_fuse_b": zeros((Cf,)),
        "layer_names": ["self", "cross"],
        "coarse_layers": [],
    }
    for _ in range(2):
        params["coarse_layers"].append({
            "wq": nrm((Cc, Cc)), "bq": zeros((Cc,)),
            "wk": nrm((Cc, Cc)), "bk": zeros((Cc,)),
            "wv": nrm((Cc, Cc)), "bv": zeros((Cc,)),
            "wm": nrm((Cc, Cc)), "bm": zeros((Cc,)),
            "w1": nrm((2 * Cc, 2 * Cc)), "b1": zeros((2 * Cc,)),
            "w2": nrm((2 * Cc, Cc)),     "b2": zeros((Cc,)),
            "ln1_g": jnp.ones((Cc,), jnp.float32), "ln1_b": zeros((Cc,)),
            "ln2_g": jnp.ones((Cc,), jnp.float32), "ln2_b": zeros((Cc,)),
        })
    return params


if __name__ == "__main__":
    config = {"resolution": (8, 2), "coarse_dim": 32, "fine_dim": 16,
              "fine_window": 3, "match_thr": 0.2, "dsmax_temperature": 0.1}
    key = jax.random.PRNGKey(0)
    pkey, k0, k1 = jax.random.split(key, 3)
    params = init_params(pkey, config)
    image0 = jax.random.normal(k0, (2, 1, 32, 32), jnp.float32)
    image1 = jax.random.normal(k1, (2, 1, 32, 32), jnp.float32)
    data = {"image0": image0, "image1": image1}
    out = loftr_forward(params, data, config)
    out = jax.block_until_ready(out)
    assert out["expec_f"].shape == (2 * 16, 3)
    assert out["conf_matrix"].shape == (2, 16, 16)
    assert bool(jnp.all(jnp.isfinite(out["conf_matrix"].astype(jnp.float32))))
    assert bool(jnp.all(jnp.isfinite(out["expec_f"])))
    assert bool(jnp.all(jnp.isfinite(out["mkpts1_f"])))
    print("KERNEL_OK")
</pallas_src>

<mosaic_0001>
module attributes {stable_mosaic.version = 11 : i64} {
  func.func @_linear_simple_kernel(%arg0: i32, %arg1: i32, %arg2: memref<64x144xbf16, #tpu.memory_space<vmem>>, %arg3: memref<144x32xbf16, #tpu.memory_space<vmem>>, %arg4: memref<1x32xf32, #tpu.memory_space<vmem>>, %arg5: memref<64x32xbf16, #tpu.memory_space<vmem>>) attributes {dimension_semantics = [#tpu.dimension_semantics<parallel>, #tpu.dimension_semantics<parallel>], iteration_bounds = array<i64: 1, 1>, scalar_prefetch = 0 : i64, scratch_operands = 0 : i64, tpu.core_type = #tpu.core_type<tc>, window_params = [{transform_indices = @transform_0, window_bounds = array<i64: 64, 144>}, {transform_indices = @transform_1, window_bounds = array<i64: 144, 32>}, {transform_indices = @transform_2, window_bounds = array<i64: 1, 32>}, {transform_indices = @transform_3, window_bounds = array<i64: 64, 32>}]} {
    %c0 = arith.constant 0 : index
    %c0_0 = arith.constant 0 : index
    %0 = vector.load %arg2[%c0, %c0_0] : memref<64x144xbf16, #tpu.memory_space<vmem>>, vector<64x144xbf16>
    %c0_1 = arith.constant 0 : index
    %c0_2 = arith.constant 0 : index
    %1 = vector.load %arg3[%c0_1, %c0_2] : memref<144x32xbf16, #tpu.memory_space<vmem>>, vector<144x32xbf16>
    %cst = arith.constant dense<0.000000e+00> : vector<64x32xf32>
    %2 = tpu.matmul %0, %1, %cst {dimension_numbers = #tpu.dot_dimension_numbers<[1], [0], [0], [1], [0, 0, 1, 1], [], []>} : vector<64x144xbf16>, vector<144x32xbf16>, vector<64x32xf32> -> vector<64x32xf32>
    %c0_3 = arith.constant 0 : index
    %c0_4 = arith.constant 0 : index
    %3 = vector.load %arg4[%c0_3, %c0_4] : memref<1x32xf32, #tpu.memory_space<vmem>>, vector<1x32xf32>
    %4 = vector.broadcast %3 : vector<1x32xf32> to vector<64x32xf32>
    %5 = arith.addf %2, %4 : vector<64x32xf32>
    %cst_5 = arith.constant 0.000000e+00 : f32
    %6 = vector.broadcast %cst_5 : f32 to vector<64x32xf32>
    %7 = arith.maximumf %5, %6 : vector<64x32xf32>
    %8 = arith.truncf %7 : vector<64x32xf32> to vector<64x32xbf16>
    %c0_6 = arith.constant 0 : index
    %c0_7 = arith.constant 0 : index
    %9 = vector.load %arg5[%c0_6, %c0_7] : memref<64x32xbf16, #tpu.memory_space<vmem>>, vector<64x32xbf16>
    tpu.vector_store %arg5[%c0_6, %c0_7], %8 {strides = array<i32>} : memref<64x32xbf16, #tpu.memory_space<vmem>>, vector<64x32xbf16>,
    return
  }
  func.func @transform_0(%arg0: i32, %arg1: i32) -> (i32, i32) {
    %c0_i32 = arith.constant 0 : i32
    %c0_i32_0 = arith.constant 0 : i32
    return %arg0, %c0_i32 : i32, i32
  }
  func.func @transform_1(%arg0: i32, %arg1: i32) -> (i32, i32) {
    %c0_i32 = arith.constant 0 : i32
    %c0_i32_0 = arith.constant 0 : i32
    return %c0_i32, %arg1 : i32, i32
  }
  func.func @transform_2(%arg0: i32, %arg1: i32) -> (i32, i32) {
    %c0_i32 = arith.constant 0 : i32
    %c0_i32_0 = arith.constant 0 : i32
    return %c0_i32, %arg1 : i32, i32
  }
  func.func @transform_3(%arg0: i32, %arg1: i32) -> (i32, i32) {
    %c0_i32 = arith.constant 0 : i32
    return %arg0, %arg1 : i32, i32
  }
}

</mosaic_0001>

<bundles_post_ra>
// kernel: tpu_custom_call.1
= control target key start
LH: loop header
LB: loop body
LE: loop exit
PB: predicated region body
PF: predicated region fallthrough
CT: control target
= control target key end

     0   :  { %vm135_vm0 = vcmask 130048   ;;  %vm222_vm1 = vcmask 257024   ;;  %s468_s1 = inlined_call_operand.vmem [shape: bf16[144,32], index: 1, kind: input, shape index: {}]   ;;  %s469_s0 = inlined_call_operand.vmem [shape: bf16[64,144], index: 0, kind: input, shape index: {}]   ;;  %s470_s2 = inlined_call_operand.vmem [shape: f32[1,32], index: 2, kind: input, shape index: {}]   ;;  %s471_s3 = inlined_call_operand.vmem [shape: bf16[64,32], index: 3, kind: output, shape index: {}]  }
   0x1   :  { %v322_v0 = vld [vmem:[%s468_s1 + $0x38] sm:$0xff]  ;;  %v323_v1 = vld [vmem:[%s468_s1 + $0x40] sm:$0xff]  ;;  %v309_v2 = vld [vmem:[%s469_s0 + $0x14] sm:$0xf] }
   0x2   :  { %v247_v3 = vld [vmem:[%s469_s0 + $0x18] sm:$0xf0]  ;;  %148 = vmatpush.bf16.msra.mxu0 %v322_v0  ;;  %324 = vmatpush.bf16.msra.mxu2 %v322_v0  ;;  %v321_v4 = vld [vmem:[%s468_s1 + $0x30] sm:$0xff]  ;;  %v307_v6 = vld [vmem:[%s469_s0 + $0x4] sm:$0xf] }
   0x3   :  { %332 = vmatpush.bf16.msra.mxu3 %v323_v1  ;;  %v250_v5 = vor.u32 %v309_v2, %v247_v3  ;;  %184 = vmatpush.bf16.msra.mxu1 %v323_v1  ;;  %v320_v7 = vld [vmem:[%s468_s1 + $0x28] sm:$0xff]  ;;  %v319_v10 = vld [vmem:[%s468_s1 + $0x20] sm:$0xff]  ;;  %v318_v11 = vld [vmem:[%s468_s1 + $0x18] sm:$0xff] }
   0x4   :  { %v239_v8 = vld [vmem:[%s469_s0 + $0x8] sm:$0xf0]  ;;  %v311_v12 = vld [vmem:[%s469_s0 + $0x24] sm:$0xf]  ;;  %v317_v14 = vld [vmem:[%s468_s1 + $0x10] sm:$0xff] }
   0x5   :  { %v242_v9 = vor.u32 %v307_v6, %v239_v8  ;;  %v255_v13 = vld [vmem:[%s469_s0 + $0x28] sm:$0xf0]  ;;  %v315_v17 = vld [vmem:[%s468_s1] sm:$0xff]  ;;  %v308_v19 = vld [vmem:[%s469_s0 + $0x4] sm:$0xf0] }
   0x6   :  { %149 = vmatpush.bf16.msra.mxu0 %v321_v4  ;;  %325 = vmatpush.bf16.msra.mxu2 %v321_v4  ;;  %v258_v15 = vor.u32 %v311_v12, %v255_v13  ;;  %v316_v16 = vld [vmem:[%s468_s1 + $0x8] sm:$0xff]  ;;  %v237_v18 = vld [vmem:[%s469_s0] sm:$0xf]  ;;  %v313_v24 = vld [vmem:[%s469_s0 + $0x34] sm:$0xf] }
   0x7   :  { %304 = vmatmul.msk.bf16.vlgmr.msra.gmra.mxu3 %vm135_vm0, %v250_v5  ;;  %303 = vmatmul.msk.bf16.vlgmr.msra.gmra.mxu1 %vm135_vm0, %v242_v9  ;;  %v253_v20 = vld [vmem:[%s469_s0 + $0x20] sm:$0xf]  ;;  %v312_v21 = vld [vmem:[%s469_s0 + $0x24] sm:$0xf0]  ;;  %v238_v22 = vor.u32 %v308_v19, %v237_v18  ;;  %v263_v25 = vld [vmem:[%s469_s0 + $0x38] sm:$0xf0] }
   0x8   :  { %v254_v23 = vor.u32 %v312_v21, %v253_v20  ;;  %v266_v26 = vor.u32 %v313_v24, %v263_v25  ;;  %v245_v27 = vld [vmem:[%s469_s0 + $0x10] sm:$0xf]  ;;  %v310_v28 = vld [vmem:[%s469_s0 + $0x14] sm:$0xf0]  ;;  %v333_v35 = vld [vmem:[%s470_s2] ss:$0 sm:$0xff] }
   0x9   :  { %v261_v29 = vld [vmem:[%s469_s0 + $0x30] sm:$0xf]  ;;  %v314_v30 = vld [vmem:[%s469_s0 + $0x34] sm:$0xf0]  ;;  %v246_v31 = vor.u32 %v310_v28, %v245_v27 }
   0xa   :  { %150 = vmatpush.bf16.msra.mxu0 %v320_v7  ;;  %326 = vmatpush.bf16.msra.mxu2 %v320_v7  ;;  %v262_v32 = vor.u32 %v314_v30, %v261_v29 }
   0xe   :  { %151 = vmatpush.bf16.msra.mxu0 %v319_v10  ;;  %327 = vmatpush.bf16.msra.mxu2 %v319_v10 }
  0x12   :  { %152 = vmatpush.bf16.msra.mxu0 %v318_v11  ;;  %328 = vmatpush.bf16.msra.mxu2 %v318_v11 }
  0x16   :  { %153 = vmatpush.bf16.msra.mxu0 %v317_v14  ;;  %329 = vmatpush.bf16.msra.mxu2 %v317_v14 }
  0x17   :  { %305 = vmatmul.msk.bf16.gmra.mxu3 %vm135_vm0, %v258_v15 }
  0x1a   :  { %154 = vmatpush.bf16.msra.mxu0 %v316_v16  ;;  %330 = vmatpush.bf16.msra.mxu2 %v316_v16 }
  0x1e   :  { %155 = vmatpush.bf16.msra.mxu0 %v315_v17  ;;  %331 = vmatpush.bf16.msra.mxu2 %v315_v17 }
  0x21   :  { %156 = vmatmul.bf16.vlgmr.msra.gmra.mxu0 %v238_v22  ;;  %166 = vmatmul.bf16.vlgmr.msra.gmra.mxu2 %v254_v23 }
  0x27   :  { %306 = vmatmul.msk.bf16.gmra.mxu3 %vm135_vm0, %v266_v26 }
  0x31   :  { %161 = vmatmul.bf16.gmra.mxu0 %v246_v31  ;;  %171 = vmatmul.bf16.gmra.mxu2 %v262_v32 }
  0x84   :  { %v186_v36 = vpop.f32.mrf.mxu1 }
  0x8a   :  { %v191_v33 = vpop.f32.mrf.mxu3 }
  0x8c   :  { %v188_v46 = vpop.f32.mrf.mxu1 }
  0x92   :  { %v193_v34 = vpop.f32.mrf.mxu3 }
  0x9a   :  { %v196_v39 = vpop.f32.mrf.mxu3 }
  0x9e   :  { %v157_v37 = vpop.f32.mrf.mxu0 }
  0x9f   :  { %v158_v38 = vadd.f32 %v333_v35, %v157_v37 }
  0xa1   :  { %v187_v40 = vadd.f32 %v186_v36, %v158_v38 }
  0xa2   :  { %v198_v51 = vpop.f32.mrf.mxu3 }
  0xa3   :  { %v206_v41 = vmax.f32 %v187_v40, 0.0 }
  0xa4   :  { %v167_v42 = vpop.f32.mrf.mxu2 }
  0xa5   :  { %v214_v43 = vpack.c.bf16 %v206_v41, %v206_v41  ;;  %v168_v44 = vadd.f32 %v333_v35, %v167_v42 }
  0xa6   :  { %v159_v45 = vpop.f32.mrf.mxu0 }
  0xa7   :  { %223 = vst.msk [vmem:[%s471_s3] sm:$0xf] %vm222_vm1, %v214_v43  ;;  %v197_v47 = vadd.f32 %v196_v39, %v168_v44  ;;  %v160_v48 = vadd.f32 %v333_v35, %v159_v45 }
  0xa9   :  { %v210_v49 = vmax.f32 %v197_v47, 0.0  ;;  %v189_v50 = vadd.f32 %v188_v46, %v160_v48 }
  0xaa   :  { %v201_v0 = vpop.f32.mrf.mxu3 }
  0xab   :  { %v218_v52 = vpack.c.bf16 %v210_v49, %v210_v49  ;;  %v207_v53 = vmax.f32 %v189_v50, 0.0 }
  0xac   :  { %v169_v54 = vpop.f32.mrf.mxu2 }
  0xad   :  { %227 = vst.msk [vmem:[%s471_s3 + $0x10] sm:$0xf] %vm222_vm1, %v218_v52  ;;  %v215_v55 = vpack.c.bf16 %v207_v53, %v207_v53  ;;  %v170_v56 = vadd.f32 %v333_v35, %v169_v54 }
  0xae   :  { %v162_v57 = vpop.f32.mrf.mxu0 }
  0xaf   :  { %224 = vst.msk [vmem:[%s471_s3 + $0x4] sm:$0xf] %vm222_vm1, %v215_v55  ;;  %v199_v58 = vadd.f32 %v198_v51, %v170_v56  ;;  %v163_v59 = vadd.f32 %v333_v35, %v162_v57 }
  0xb1   :  { %v211_v60 = vmax.f32 %v199_v58, 0.0  ;;  %v192_v61 = vadd.f32 %v191_v33, %v163_v59 }
  0xb2   :  { %v203_v14 = vpop.f32.mrf.mxu3 }
  0xb3   :  { %v219_v62 = vpack.c.bf16 %v211_v60, %v211_v60  ;;  %v208_v63 = vmax.f32 %v192_v61, 0.0 }
  0xb4   :  { %v172_v1 = vpop.f32.mrf.mxu2 }
  0xb5   :  { %228 = vst.msk [vmem:[%s471_s3 + $0x14] sm:$0xf] %vm222_vm1, %v219_v62  ;;  %v216_v2 = vpack.c.bf16 %v208_v63, %v208_v63  ;;  %v173_v3 = vadd.f32 %v333_v35, %v172_v1 }
  0xb6   :  { %v164_v4 = vpop.f32.mrf.mxu0 }
  0xb7   :  { %225 = vst.msk [vmem:[%s471_s3 + $0x8] sm:$0xf] %vm222_vm1, %v216_v2  ;;  %v202_v5 = vadd.f32 %v201_v0, %v173_v3  ;;  %v165_v6 = vadd.f32 %v333_v35, %v164_v4 }
  0xb9   :  { %v212_v7 = vmax.f32 %v202_v5, 0.0  ;;  %v194_v8 = vadd.f32 %v193_v34, %v165_v6 }
  0xbb   :  { %v220_v9 = vpack.c.bf16 %v212_v7, %v212_v7  ;;  %v209_v10 = vmax.f32 %v194_v8, 0.0 }
  0xbc   :  { %v174_v11 = vpop.f32.mrf.mxu2 }
  0xbd   :  { %229 = vst.msk [vmem:[%s471_s3 + $0x18] sm:$0xf] %vm222_vm1, %v220_v9  ;;  %v217_v12 = vpack.c.bf16 %v209_v10, %v209_v10  ;;  %v175_v13 = vadd.f32 %v333_v35, %v174_v11 }
  0xbf   :  { %226 = vst.msk [vmem:[%s471_s3 + $0xc] sm:$0xf] %vm222_vm1, %v217_v12  ;;  %v204_v15 = vadd.f32 %v203_v14, %v175_v13 }
  0xc1   :  { %v213_v16 = vmax.f32 %v204_v15, 0.0 }
  0xc3   :  { %v221_v17 = vpack.c.bf16 %v213_v16, %v213_v16 }
  0xc5   :  { %230 = vst.msk [vmem:[%s471_s3 + $0x1c] sm:$0xf] %vm222_vm1, %v221_v17 }

</bundles_post_ra>
